<compile_context>
chip_gen: v6e
topology: v6e:2x2x1
jax: 0.10.0
libtpu: 0.0.40
codegen_flags: <defaults>
</compile_context>

<pallas_src>
import functools

import jax
import jax.numpy as jnp
from jax.experimental import pallas as pl
from jax.experimental.pallas import tpu as pltpu

BN_EPS = 1e-5


# --------------------------------------------------------------------------- #
# Kernel
# --------------------------------------------------------------------------- #
def fcl_kernel(x_ref, w_ref, gb_ref, o_ref, acc_ref):
    """Grid = (feature_tiles, k_tiles).

    x_ref:   (B, TK)   activations (f32; cast to matmul dtype in-kernel)
    w_ref:   (TK, TN)  K-major weight tile (matmul dtype)
    gb_ref:  (2, TN)   packed [gamma; beta] (f32)
    o_ref:   (B, TN)   output tile
    acc_ref: (B, TN)   f32 accumulator scratch (resident across the K axis)
    """
    k = pl.program_id(1)

    xk = x_ref[...]
    wk = w_ref[...]
    if xk.dtype != wk.dtype:                 # tiny (B, TK) cast, hidden under weight DMA
        xk = xk.astype(wk.dtype)

    # K-major rhs -> straight MXU feed, no per-tile transpose. f32 accumulation.
    h_part = jax.lax.dot_general(
        xk, wk,
        dimension_numbers=(((1,), (0,)), ((), ())),
        preferred_element_type=jnp.float32,
    )                                        # (B, TN) f32

    @pl.when(k == 0)
    def _():
        acc_ref[...] = h_part

    @pl.when(k > 0)
    def _():
        acc_ref[...] += h_part

    @pl.when(k == pl.num_programs(1) - 1)
    def _():
        h = acc_ref[...]
        # One-pass training-mode BatchNorm stats (biased variance), fused affine.
        inv_b = jnp.float32(1.0 / h.shape[0])
        s1 = jnp.sum(h, axis=0, keepdims=True)            # (1, TN)
        s2 = jnp.sum(h * h, axis=0, keepdims=True)        # (1, TN)
        mean = s1 * inv_b
        var = jnp.maximum(s2 * inv_b - mean * mean, 0.0)  # clamp: guard rsqrt NaN
        scale = gb_ref[0:1, :] * jax.lax.rsqrt(var + BN_EPS)
        shift = gb_ref[1:2, :] - scale * mean
        # Normalize + affine as a single FMA over (B, TN), then Tanh.
        o_ref[...] = jnp.tanh(h * scale + shift).astype(o_ref.dtype)


# --------------------------------------------------------------------------- #
# One-time parameter preparation (persistent layout/dtype; NOT per-call)
# --------------------------------------------------------------------------- #
def prepare_fcl_params(weight, bias, gamma, beta, matmul_dtype=jnp.bfloat16):
    """Convert parameters once into the kernel-friendly persistent layout.

    * weight stored K-major (in_dim, out_dim) in `matmul_dtype` -> no per-call
      f32->bf16 HBM pass and no per-tile transpose.
    * gamma/beta packed into one (2, out_dim) f32 array -> one DMA per tile.
    * Linear bias is mathematically inert under training-mode BatchNorm (batch-mean
      subtraction cancels it exactly), so it is not part of the kernel inputs.
    """
    del bias
    w_t = jnp.asarray(weight).T.astype(matmul_dtype)                 # (in_dim, out_dim)
    gb = jnp.stack([jnp.asarray(gamma, jnp.float32),
                    jnp.asarray(beta, jnp.float32)], axis=0)         # (2, out_dim)
    return w_t, gb


# --------------------------------------------------------------------------- #
# Tiling / VMEM sizing helpers
# --------------------------------------------------------------------------- #
def _vmem_capacity_bytes():
    try:
        return int(pltpu.get_tpu_info().vmem_capacity_bytes)
    except Exception:
        return 64 * 1024 * 1024  # conservative default: v7x per-TC VMEM


def _tile_candidates(dim):
    """Descending lane-aligned tile sizes dividing `dim`; full-extent fallback."""
    if dim % 128 == 0:
        return [t for t in range(dim, 0, -128) if dim % t == 0]
    return [dim]  # full-extent block (allowed even when not (8,128)-aligned)


def _pick_tiles(batch, in_dim, out_dim, w_itemsize, x_itemsize, out_itemsize, budget):
    """Pick (TN, TK), preferring full-K (x resident, no K loop), then the widest
    lane-dense feature tile whose double-buffered working set fits the budget."""
    tn_cands = _tile_candidates(out_dim)
    tk_cands = _tile_candidates(in_dim)

    def usage(tn, tk):
        nk = in_dim // tk
        w_b = 2 * tk * tn * w_itemsize                           # dbl-buffered weight tile
        x_b = (1 if nk == 1 else 2) * batch * tk * x_itemsize    # Buffered(1) when resident
        o_b = 2 * batch * tn * out_itemsize                      # dbl-buffered output tile
        gb_b = 2 * 2 * tn * 4                                    # packed gamma/beta
        acc_b = batch * tn * 4                                   # f32 accumulator scratch
        tmp_b = 2 * batch * tn * 4                               # in-kernel h / h*h temps
        return w_b + x_b + o_b + gb_b + acc_b + tmp_b

    for tk in tk_cands:
        for tn in tn_cands:
            if usage(tn, tk) <= budget:
                return tn, tk
    return tn_cands[-1], tk_cands[-1]  # best effort (smallest tiles)


def _spec(shape, index_map, buffers=None):
    if buffers is not None:
        try:
            return pl.BlockSpec(shape, index_map, pipeline_mode=pl.Buffered(buffers))
        except TypeError:
            pass
    return pl.BlockSpec(shape, index_map)


# --------------------------------------------------------------------------- #
# Forward
# --------------------------------------------------------------------------- #
@functools.partial(jax.jit, static_argnames=("out_dtype",))
def fcl_forward(x, w_t, gb, *, out_dtype=jnp.float32):
    """x: (B, in_dim) f32; w_t: (in_dim, out_dim) persistent matmul-dtype weight;
    gb: (2, out_dim) f32 packed [gamma; beta]."""
    B, in_dim = x.shape
    k_dim, out_dim = w_t.shape
    assert k_dim == in_dim
    assert gb.shape == (2, out_dim)

    # Generation-aware VMEM budget (128 MiB v5e/v6e, 64 MiB v7x), with headroom.
    cap = _vmem_capacity_bytes()
    vmem_limit = min(cap * 3 // 4, 96 * 1024 * 1024)
    tile_budget = vmem_limit * 3 // 4

    tn, tk = _pick_tiles(
        B, in_dim, out_dim,
        jnp.dtype(w_t.dtype).itemsize,
        jnp.dtype(x.dtype).itemsize,
        jnp.dtype(out_dtype).itemsize,
        tile_budget,
    )
    nj, nk = out_dim // tn, in_dim // tk

    in_specs = [
        # x: resident across feature tiles; single-buffer when its block never changes.
        _spec((B, tk), lambda j, k: (0, k), buffers=1 if nk == 1 else None),
        # Streamed K-major weight tile (default double-buffering; sweep Buffered(3) if
        # DMA issue latency shows up in traces).
        _spec((tk, tn), lambda j, k: (k, j)),
        # Packed gamma/beta.
        _spec((2, tn), lambda j, k: (0, j)),
    ]
    out_spec = pl.BlockSpec((B, tn), lambda j, k: (0, j))  # lane-dense output tile

    return pl.pallas_call(
        fcl_kernel,
        out_shape=jax.ShapeDtypeStruct((B, out_dim), out_dtype),
        grid=(nj, nk),
        in_specs=in_specs,
        out_specs=out_spec,
        scratch_shapes=[pltpu.VMEM((B, tn), jnp.float32)],
        compiler_params=pltpu.CompilerParams(
            # Feature tiles are independent -> "parallel" (shards across TCs on v7x;
            # near-neutral on single-TC chips). K axis is a reduction -> "arbitrary".
            # On v7x, pltpu.CORE_PARALLEL is a candidate to measure against.
            dimension_semantics=("parallel", "arbitrary"),
            vmem_limit_bytes=vmem_limit,
        ),
    )(x, w_t, gb)


# --------------------------------------------------------------------------- #
# Demo / self-test
# --------------------------------------------------------------------------- #
if __name__ == "__main__":
    B, in_dim, out_dim = 16, 128, 256

    key = jax.random.PRNGKey(0)
    kx, kw, kb = jax.random.split(key, 3)

    x = jax.random.normal(kx, (B, in_dim), dtype=jnp.float32)

    # Deterministic parameter init (mimics nn.Linear's uniform(-1/sqrt(in), 1/sqrt(in)))
    bound = 1.0 / (in_dim ** 0.5)
    weight = jax.random.uniform(kw, (out_dim, in_dim), jnp.float32, -bound, bound)
    bias = jax.random.uniform(kb, (out_dim,), jnp.float32, -bound, bound)
    gamma = jnp.ones((out_dim,), jnp.float32)   # BatchNorm1d weight init
    beta = jnp.zeros((out_dim,), jnp.float32)   # BatchNorm1d bias init

    # One-time persistent prep: bf16 K-major weight + packed gamma/beta.
    w_t, gb = prepare_fcl_params(weight, bias, gamma, beta, matmul_dtype=jnp.bfloat16)

    out = fcl_forward(x, w_t, gb)
    jax.block_until_ready(out)

    # (a) Matched-precision reference (bf16 matmul operands, f32 elsewhere; bias
    #     included to demonstrate it cancels under training-mode BatchNorm).
    xb = x.astype(jnp.bfloat16).astype(jnp.float32)
    wb = weight.astype(jnp.bfloat16).astype(jnp.float32)
    h_ref = xb @ wb.T + bias
    m = h_ref.mean(0, keepdims=True)
    v = ((h_ref - m) ** 2).mean(0, keepdims=True)
    ref_matched = jnp.tanh(gamma * (h_ref - m) / jnp.sqrt(v + BN_EPS) + beta)
    err_matched = float(jnp.max(jnp.abs(out - ref_matched)))
    assert jnp.allclose(out, ref_matched, atol=1e-4, rtol=1e-4), err_matched

    # (b) Full-f32 reference (true module precision) — bounds the bf16 operand delta.
    h32 = x @ weight.T + bias
    m32 = h32.mean(0, keepdims=True)
    v32 = ((h32 - m32) ** 2).mean(0, keepdims=True)
    ref_f32 = jnp.tanh(gamma * (h32 - m32) / jnp.sqrt(v32 + BN_EPS) + beta)
    err_f32 = float(jnp.max(jnp.abs(out - ref_f32)))
    assert err_f32 < 5e-2, err_f32

    print("KERNEL_OK")
</pallas_src>

<mosaic_0001>
module attributes {stable_mosaic.version = 11 : i64} {
  func.func @fcl_kernel(%arg0: i32, %arg1: i32, %arg2: memref<16x128xf32, #tpu.memory_space<vmem>>, %arg3: memref<128x256xbf16, #tpu.memory_space<vmem>>, %arg4: memref<2x256xf32, #tpu.memory_space<vmem>>, %arg5: memref<16x256xf32, #tpu.memory_space<vmem>>, %arg6: memref<16x256xf32, #tpu.memory_space<vmem>>) attributes {dimension_semantics = [#tpu.dimension_semantics<parallel>, #tpu.dimension_semantics<arbitrary>], iteration_bounds = array<i64: 1, 1>, scalar_prefetch = 0 : i64, scratch_operands = 1 : i64, tpu.core_type = #tpu.core_type<tc>, window_params = [{pipeline_mode = #tpu.pipeline_mode<synchronous>, transform_indices = @transform_0, window_bounds = array<i64: 16, 128>}, {transform_indices = @transform_1, window_bounds = array<i64: 128, 256>}, {transform_indices = @transform_2, window_bounds = array<i64: 2, 256>}, {transform_indices = @transform_3, window_bounds = array<i64: 16, 256>}]} {
    %c0 = arith.constant 0 : index
    %c0_0 = arith.constant 0 : index
    %0 = vector.load %arg2[%c0, %c0_0] : memref<16x128xf32, #tpu.memory_space<vmem>>, vector<16x128xf32>
    %c0_1 = arith.constant 0 : index
    %c0_2 = arith.constant 0 : index
    %1 = vector.load %arg3[%c0_1, %c0_2] : memref<128x256xbf16, #tpu.memory_space<vmem>>, vector<128x256xbf16>
    %2 = arith.truncf %0 : vector<16x128xf32> to vector<16x128xbf16>
    %cst = arith.constant dense<0.000000e+00> : vector<16x256xf32>
    %3 = tpu.matmul %2, %1, %cst {dimension_numbers = #tpu.dot_dimension_numbers<[1], [0], [0], [1], [0, 0, 1, 1], [], []>} : vector<16x128xbf16>, vector<128x256xbf16>, vector<16x256xf32> -> vector<16x256xf32>
    %c0_i32 = arith.constant 0 : i32
    %4 = arith.cmpi eq, %arg1, %c0_i32 : i32
    %5 = arith.extui %4 : i1 to i32
    %c0_i32_3 = arith.constant 0 : i32
    %6 = arith.cmpi ne, %5, %c0_i32_3 : i32
    scf.if %6 {
      %c0_8 = arith.constant 0 : index
      %c0_9 = arith.constant 0 : index
      %13 = vector.load %arg6[%c0_8, %c0_9] : memref<16x256xf32, #tpu.memory_space<vmem>>, vector<16x256xf32>
      tpu.vector_store %arg6[%c0_8, %c0_9], %3 {strides = array<i32>} : memref<16x256xf32, #tpu.memory_space<vmem>>, vector<16x256xf32>,
    } else {
    }
    %c0_i32_4 = arith.constant 0 : i32
    %7 = arith.cmpi sgt, %arg1, %c0_i32_4 : i32
    %8 = arith.extui %7 : i1 to i32
    %c0_i32_5 = arith.constant 0 : i32
    %9 = arith.cmpi ne, %8, %c0_i32_5 : i32
    scf.if %9 {
      %c0_8 = arith.constant 0 : index
      %c0_9 = arith.constant 0 : index
      %13 = vector.load %arg6[%c0_8, %c0_9] : memref<16x256xf32, #tpu.memory_space<vmem>>, vector<16x256xf32>
      %14 = arith.addf %13, %3 : vector<16x256xf32>
      %c0_10 = arith.constant 0 : index
      %c0_11 = arith.constant 0 : index
      %15 = vector.load %arg6[%c0_10, %c0_11] : memref<16x256xf32, #tpu.memory_space<vmem>>, vector<16x256xf32>
      tpu.vector_store %arg6[%c0_10, %c0_11], %14 {strides = array<i32>} : memref<16x256xf32, #tpu.memory_space<vmem>>, vector<16x256xf32>,
    } else {
    }
    %c0_i32_6 = arith.constant 0 : i32
    %10 = arith.cmpi eq, %arg1, %c0_i32_6 : i32
    %11 = arith.extui %10 : i1 to i32
    %c0_i32_7 = arith.constant 0 : i32
    %12 = arith.cmpi ne, %11, %c0_i32_7 : i32
    scf.if %12 {
      %c0_8 = arith.constant 0 : index
      %c0_9 = arith.constant 0 : index
      %13 = vector.load %arg6[%c0_8, %c0_9] : memref<16x256xf32, #tpu.memory_space<vmem>>, vector<16x256xf32>
      %cst_10 = arith.constant dense<0.000000e+00> : vector<256xf32>
      %14 = vector.multi_reduction <add>, %13, %cst_10 [0] : vector<16x256xf32> to vector<256xf32>
      %15 = vector.shape_cast %14 : vector<256xf32> to vector<1x256xf32>
      %16 = arith.mulf %13, %13 : vector<16x256xf32>
      %cst_11 = arith.constant dense<0.000000e+00> : vector<256xf32>
      %17 = vector.multi_reduction <add>, %16, %cst_11 [0] : vector<16x256xf32> to vector<256xf32>
      %18 = vector.shape_cast %17 : vector<256xf32> to vector<1x256xf32>
      %cst_12 = arith.constant 6.250000e-02 : f32
      %19 = vector.broadcast %cst_12 : f32 to vector<1x256xf32>
      %20 = arith.mulf %15, %19 : vector<1x256xf32>
      %cst_13 = arith.constant 6.250000e-02 : f32
      %21 = vector.broadcast %cst_13 : f32 to vector<1x256xf32>
      %22 = arith.mulf %18, %21 : vector<1x256xf32>
      %23 = arith.mulf %20, %20 : vector<1x256xf32>
      %24 = arith.subf %22, %23 : vector<1x256xf32>
      %cst_14 = arith.constant 0.000000e+00 : f32
      %25 = vector.broadcast %cst_14 : f32 to vector<1x256xf32>
      %26 = arith.maximumf %24, %25 : vector<1x256xf32>
      %c0_15 = arith.constant 0 : index
      %c0_16 = arith.constant 0 : index
      %27 = vector.load %arg4[%c0_15, %c0_16] : memref<2x256xf32, #tpu.memory_space<vmem>>, vector<1x256xf32>
      %cst_17 = arith.constant 9.99999974E-6 : f32
      %28 = vector.broadcast %cst_17 : f32 to vector<1x256xf32>
      %29 = arith.addf %26, %28 : vector<1x256xf32>
      %30 = math.rsqrt %29 : vector<1x256xf32>
      %31 = arith.mulf %27, %30 : vector<1x256xf32>
      %c1 = arith.constant 1 : index
      %c0_18 = arith.constant 0 : index
      %32 = vector.load %arg4[%c1, %c0_18] : memref<2x256xf32, #tpu.memory_space<vmem>>, vector<1x256xf32>
      %33 = arith.mulf %31, %20 : vector<1x256xf32>
      %34 = arith.subf %32, %33 : vector<1x256xf32>
      %35 = vector.broadcast %31 : vector<1x256xf32> to vector<16x256xf32>
      %36 = arith.mulf %13, %35 : vector<16x256xf32>
      %37 = vector.broadcast %34 : vector<1x256xf32> to vector<16x256xf32>
      %38 = arith.addf %36, %37 : vector<16x256xf32>
      %39 = math.tanh %38 : vector<16x256xf32>
      %c0_19 = arith.constant 0 : index
      %c0_20 = arith.constant 0 : index
      %40 = vector.load %arg5[%c0_19, %c0_20] : memref<16x256xf32, #tpu.memory_space<vmem>>, vector<16x256xf32>
      tpu.vector_store %arg5[%c0_19, %c0_20], %39 {strides = array<i32>} : memref<16x256xf32, #tpu.memory_space<vmem>>, vector<16x256xf32>,
    } else {
    }
    return
  }
  func.func @transform_0(%arg0: i32, %arg1: i32) -> (i32, i32) {
    %c0_i32 = arith.constant 0 : i32
    %c0_i32_0 = arith.constant 0 : i32
    return %c0_i32, %arg1 : i32, i32
  }
  func.func @transform_1(%arg0: i32, %arg1: i32) -> (i32, i32) {
    %c0_i32 = arith.constant 0 : i32
    return %arg1, %arg0 : i32, i32
  }
  func.func @transform_2(%arg0: i32, %arg1: i32) -> (i32, i32) {
    %c0_i32 = arith.constant 0 : i32
    %c0_i32_0 = arith.constant 0 : i32
    return %c0_i32, %arg0 : i32, i32
  }
  func.func @transform_3(%arg0: i32, %arg1: i32) -> (i32, i32) {
    %c0_i32 = arith.constant 0 : i32
    %c0_i32_0 = arith.constant 0 : i32
    return %c0_i32, %arg0 : i32, i32
  }
}

</mosaic_0001>

<bundles_post_ra>
// kernel: fcl_forward.1
= control target key start
LH: loop header
LB: loop body
LE: loop exit
PB: predicated region body
PF: predicated region fallthrough
CT: control target
= control target key end

     0   :  { %8 = vsyncpa [#allocation4], 0  ;;  %s586_s0 = inlined_call_operand.hbm [shape: f32[16,128], index: 0, kind: input, shape index: {}]   ;;  %s587_s1 = inlined_call_operand.hbm [shape: bf16[128,256], index: 1, kind: input, shape index: {}]   ;;  %s588_s2 = inlined_call_operand.hbm [shape: f32[2,256], index: 2, kind: input, shape index: {}]   ;;  %s589_s3 = inlined_call_operand.hbm [shape: f32[16,256], index: 3, kind: output, shape index: {}]  }
   0x1   :  { %9 = vsyncpa [#allocation7], 0 }
   0x2   :  { %10 = vsyncpa [#allocation5], 0  ;;  %s520_s12 = smov [#allocation6]   ;;  %s521_s14 = smov [#allocation3]  }
   0x3   :  { %s28_s13 = sshll.u32 %s520_s12, 4  ;;  %s16_s15 = sshll.u32 %s521_s14, 4  ;;  %s29_s13 = int_to_ptr.vmem [resolvable:$true] %s28_s13  ;;  %s17_s15 = int_to_ptr.vmem [resolvable:$true] %s16_s15 }
   0x4   :  { %s442_s16 = scalar_lea.vmem %s29_s13, 2048  ;;  %p447_p1 = scmp.lt.s32.totalorder %s29_s13, %s29_s13 }
   0x5   :  { %p443_p0 = scmp.ne.s32.totalorder %s29_s13, %s442_s16  ;;  %p448_p2 = scmp.lt.s32.totalorder %s442_s16, %s442_s16 }
   0x7   :  { %p449_p3 = por %p448_p2, %p447_p1 }
   0x9   :  { %p450_p4 = pnand %p449_p3, %p443_p0 }
   0xb   :  { %453 = shalt.err (!%p450_p4)
}
   0xc   :  { %s522_s17 = smov 128   ;;  %s523_s18 = smov 8  }
   0xd   :  { %34 = dma.hbm_to_vmem [thread:$0]  %s587_s1, 2048, %s29_s13, [#allocation7], %s522_s17, %s522_s17, %s523_s18  }
   0xe   :  { %s462_s21 = scalar_lea.vmem %s17_s15, 256  ;;  %p467_p6 = scmp.lt.s32.totalorder %s17_s15, %s17_s15 }
   0xf   :  { %p463_p5 = scmp.ne.s32.totalorder %s17_s15, %s462_s21  ;;  %p468_p7 = scmp.lt.s32.totalorder %s462_s21, %s462_s21 }
  0x11   :  { %p469_p8 = por %p468_p7, %p467_p6 }
  0x13   :  { %p470_p9 = pnand %p469_p8, %p463_p5 }
  0x15   :  { %473 = shalt.err (!%p470_p9)
}
  0x16   :  { %22 = dma.hbm_to_vmem [thread:$0]  %s586_s0, 256, %s17_s15, [#allocation4], %s522_s17, %s522_s17, %s523_s18  }
  0x17   :  { %s524_s24 = smov [#allocation8]  }
  0x18   :  { %s41_s25 = sshll.u32 %s524_s24, 4  ;;  %s42_s25 = int_to_ptr.vmem [resolvable:$true] %s41_s25 }
  0x19   :  { %s482_s26 = scalar_lea.vmem %s42_s25, 64  ;;  %p487_p11 = scmp.lt.s32.totalorder %s42_s25, %s42_s25 }
  0x1a   :  { %p483_p10 = scmp.ne.s32.totalorder %s42_s25, %s482_s26  ;;  %p488_p12 = scmp.lt.s32.totalorder %s482_s26, %s482_s26 }
  0x1c   :  { %p489_p13 = por %p488_p12, %p487_p11 }
  0x1e   :  { %p490_p0 = pnand %p489_p13, %p483_p10 }
  0x20   :  { %493 = shalt.err (!%p490_p0)
}
  0x21   :  { %44 = dma.hbm_to_vmem [thread:$0]  %s588_s2, 64, %s42_s25, [#allocation7]  }
  0x22   :  { %514 = dma.done.wait [#allocation4], 256  }
  0x23   :  { %515 = vsyncadd [#allocation4], 4294967040 }
  0x24   :  { %516 = dma.done.wait [#allocation7], 2112  }
  0x25   :  { %517 = vsyncadd [#allocation7], 4294965184  ;;  %v525_v0 = vmov 0   ;;  %v398_v1 = vld [vmem:[#allocation6 + $0x74] ss:$8 sps:$4 sm:$0xff]   ;;  %s527_s0 = smov [#allocation9]  }
  0x26   :  { %186 = vmatprep.mubr.bf16.mxu0 %v525_v0  ;;  %v400_v2 = vld [vmem:[#allocation6 + $0x70] ss:$8 sps:$4 sm:$0xff]   ;;  %154 = vmatprep.subr.bf16.mxu0 %v398_v1  ;;  %v401_v3 = vld [vmem:[#allocation6 + $0x64] ss:$8 sps:$4 sm:$0xff]   ;;  %v403_v4 = vld [vmem:[#allocation6 + $0x60] ss:$8 sps:$4 sm:$0xff]  }
  0x27   :  { %155 = vmatpush1.bf16.msra.mxu0 %v400_v2  ;;  %v404_v5 = vld [vmem:[#allocation6 + $0x54] ss:$8 sps:$4 sm:$0xff]   ;;  %v406_v6 = vld [vmem:[#allocation6 + $0x50] ss:$8 sps:$4 sm:$0xff]   ;;  %v407_v7 = vld [vmem:[#allocation6 + $0x44] ss:$8 sps:$4 sm:$0xff]  }
  0x28   :  { %156 = vmatprep.subr.bf16.mxu0 %v401_v3  ;;  %v409_v8 = vld [vmem:[#allocation6 + $0x40] ss:$8 sps:$4 sm:$0xff]   ;;  %v410_v9 = vld [vmem:[#allocation6 + $0x34] ss:$8 sps:$4 sm:$0xff]   ;;  %v412_v10 = vld [vmem:[#allocation6 + $0x30] ss:$8 sps:$4 sm:$0xff]  }
  0x29   :  { %v413_v11 = vld [vmem:[#allocation6 + $0x24] ss:$8 sps:$4 sm:$0xff]   ;;  %v415_v12 = vld [vmem:[#allocation6 + $0x20] ss:$8 sps:$4 sm:$0xff]   ;;  %v416_v13 = vld [vmem:[#allocation6 + $0x14] ss:$8 sps:$4 sm:$0xff]  }
  0x2a   :  { %v418_v14 = vld [vmem:[#allocation6 + $0x10] ss:$8 sps:$4 sm:$0xff]   ;;  %v419_v15 = vld [vmem:[#allocation6 + $0x4] ss:$8 sps:$4 sm:$0xff]   ;;  %v421_v16 = vld [vmem:[#allocation6] ss:$8 sps:$4 sm:$0xff]  }
  0x2b   :  { %157 = vmatpush1.bf16.msra.mxu0 %v403_v4  ;;  %v55_v17 = vld [vmem:[#allocation3] sm:$0xff]  ;;  %v56_v18 = vld [vmem:[#allocation3 + $0x8] sm:$0xff]  ;;  %v526_v4 = vmov 1966171168   ;;  %s359_s2 = sshll.u32 %s527_s0, 4  ;;  %s360_s2 = int_to_ptr.vmem [resolvable:$true] %s359_s2 }
  0x2c   :  { %158 = vmatprep.subr.bf16.mxu0 %v404_v5  ;;  %v73_v19 = vpack.c.bf16 %v56_v18, %v55_v17  ;;  %v279_v5 = vunpack.c.l.s4 %v526_v4  ;;  %s494_s28 = scalar_lea.vmem %s360_s2, 512  ;;  %p499_p2 = scmp.lt.s32.totalorder %s360_s2, %s360_s2 }
  0x2d   :  { %p495_p1 = scmp.ne.s32.totalorder %s360_s2, %s494_s28  ;;  %p500_p3 = scmp.lt.s32.totalorder %s494_s28, %s494_s28 }
  0x2f   :  { %159 = vmatpush1.bf16.msra.mxu0 %v406_v6  ;;  %v281_v6 = vlaneseq  ;;  %p501_p4 = por %p500_p3, %p499_p2 }
  0x30   :  { %160 = vmatprep.subr.bf16.mxu0 %v407_v7  ;;  %v280_v7 = vunpack.c.0.s8 %v279_v5 }
  0x31   :  { %p502_p5 = pnand %p501_p4, %p495_p1 }
  0x33   :  { %161 = vmatpush1.bf16.msra.mxu0 %v409_v8  ;;  %v282_v8 = vshrl.u32 %v281_v6, 7 }
  0x34   :  { %162 = vmatprep.subr.bf16.mxu0 %v410_v9 }
  0x35   :  { %v319_v18 = vsub.s32 0, %v282_v8 }
  0x37   :  { %163 = vmatpush1.bf16.msra.mxu0 %v412_v10  ;;  %v283_v10 = vsub.s32 %v280_v7, %v282_v8 }
  0x38   :  { %164 = vmatprep.subr.bf16.mxu0 %v413_v11 }
  0x3b   :  { %165 = vmatpush1.bf16.msra.mxu0 %v415_v12 }
  0x3c   :  { %166 = vmatprep.subr.bf16.mxu0 %v416_v13 }
  0x3f   :  { %167 = vmatpush1.bf16.msra.mxu0 %v418_v14 }
  0x40   :  { %168 = vmatprep.subr.bf16.mxu0 %v419_v15 }
  0x43   :  { %169 = vmatpush1.bf16.msra.mxu0 %v421_v16  ;;  %v270_v16 = vld [vmem:[#allocation8] ss:$2 sm:$0x3] }
  0x46   :  { %187 = vmatmul.mubr.bf16.vlgmr.msra.gmra.mxu0 %v73_v19  ;;  %v323_v19 = vsub.s32 1, %v282_v8 }
 0x106   :  { %v559_v20 = vpop.f32.mrf.mxu0 }
 0x107   :  { %v242_v23 = vmul.f32 %v559_v20, %v559_v20 }
 0x108   :  { %v561_v21 = vpop.f32.mrf.mxu0 }
 0x109   :  { %v243_v26 = vmul.f32 %v561_v21, %v561_v21 }
 0x10a   :  { %v563_v22 = vpop.f32.mrf.mxu0 }
 0x10b   :  { %v228_v24 = vadd.f32 %v563_v22, %v559_v20  ;;  %v244_v25 = vmul.f32 %v563_v22, %v563_v22 }
 0x10c   :  { %v573_v27 = vpop.f32.mrf.mxu0 }
 0x10d   :  { %v229_v28 = vrot.slane %v228_v24, 4  ;;  %v246_v29 = vadd.f32 %v244_v25, %v242_v23  ;;  %v235_v30 = vadd.f32 %v573_v27, %v561_v21  ;;  %v245_v31 = vmul.f32 %v573_v27, %v573_v27  ;;  %v295_v25 = vld [vmem:[#allocation8 + $0x1] ss:$2 sm:$0x3] }
 0x10f   :  { %v230_v32 = vadd.f32 %v229_v28, %v228_v24  ;;  %v247_v33 = vrot.slane %v246_v29, 4  ;;  %v236_v34 = vrot.slane %v235_v30, 4  ;;  %v253_v35 = vadd.f32 %v245_v31, %v243_v26 }
 0x111   :  { %v231_v36 = vrot.slane %v230_v32, 2  ;;  %v248_v37 = vadd.f32 %v247_v33, %v246_v29  ;;  %v237_v38 = vadd.f32 %v236_v34, %v235_v30  ;;  %v254_v39 = vrot.slane %v253_v35, 4 }
 0x113   :  { %v232_v40 = vadd.f32 %v231_v36, %v230_v32  ;;  %v249_v41 = vrot.slane %v248_v37, 2  ;;  %v238_v42 = vrot.slane %v237_v38, 2  ;;  %v255_v43 = vadd.f32 %v254_v39, %v253_v35 }
 0x115   :  { %v233_v44 = vrot.slane %v232_v40, 1  ;;  %v250_v45 = vadd.f32 %v249_v41, %v248_v37  ;;  %v239_v46 = vadd.f32 %v238_v42, %v237_v38  ;;  %v256_v47 = vrot.slane %v255_v43, 2 }
 0x117   :  { %v234_v48 = vadd.f32 %v233_v44, %v232_v40  ;;  %v251_v49 = vrot.slane %v250_v45, 1  ;;  %v240_v50 = vrot.slane %v239_v46, 1  ;;  %v257_v51 = vadd.f32 %v256_v47, %v255_v43 }
 0x119   :  { %v252_v52 = vadd.f32 %v251_v49, %v250_v45  ;;  %v260_v53 = vmul.f32 0.0625, %v234_v48  ;;  %v241_v54 = vadd.f32 %v240_v50, %v239_v46  ;;  %v258_v55 = vrot.slane %v257_v51, 1 }
 0x11b   :  { %v262_v56 = vmul.f32 0.0625, %v252_v52  ;;  %v264_v57 = vmul.f32 %v260_v53, %v260_v53  ;;  %v259_v58 = vadd.f32 %v258_v55, %v257_v51  ;;  %v261_v59 = vmul.f32 0.0625, %v241_v54 }
 0x11d   :  { %v266_v60 = vsub.f32 %v262_v56, %v264_v57  ;;  %v263_v61 = vmul.f32 0.0625, %v259_v58  ;;  %v265_v62 = vmul.f32 %v261_v59, %v261_v59  ;;  %v298_v11 = vcombine.low %v260_v53, %v261_v59 }
 0x11f   :  { %v268_v63 = vmax.f32 %v266_v60, 0.0  ;;  %v267_v0 = vsub.f32 %v263_v61, %v265_v62  ;;  %v305_v15 = vrot.slane %v298_v11, %v283_v10 }
 0x121   :  { %v271_v1 = vadd.f32 1e-05, %v268_v63  ;;  %v269_v2 = vmax.f32 %v267_v0, 0.0  ;;  %v312_v24 = vrot.slane %v305_v15, %v283_v10 }
 0x123   :  { %v272_v3 = vadd.f32 1e-05, %v269_v2  ;;  %422 = vrsqrt.f32 %v271_v1 }
 0x125   :  { %424 = vrsqrt.f32 %v272_v3 }
 0x130   :  { %v423_v9 = vpop.eup %422 }
 0x132   :  { %v425_v12 = vpop.eup %424 }
 0x133   :  { %v277_v13 = vcombine.low %v423_v9, %v425_v12 }
 0x135   :  { %v284_v14 = vrot.slane %v277_v13, %v283_v10 }
 0x137   :  { %v291_v17 = vrot.slane %v284_v14, %v283_v10 }
 0x139   :  { %v293_v23 = vmul.f32 %v291_v17, %v270_v16 }
 0x13b   :  { %v314_v26 = vmul.f32 %v312_v24, %v293_v23  ;;  %v320_v28 = vrot.slane %v293_v23, %v319_v18  ;;  %v324_v29 = vrot.slane %v293_v23, %v323_v19 }
 0x13d   :  { %v315_v30 = vsub.f32 %v295_v25, %v314_v26  ;;  %v327_v31 = vmul.f32 %v320_v28, %v559_v20  ;;  %v328_v32 = vmul.f32 %v324_v29, %v561_v21  ;;  %v329_v33 = vmul.f32 %v320_v28, %v563_v22 }
 0x13e   :  { %v330_v36 = vmul.f32 %v324_v29, %v573_v27 }
 0x13f   :  { %v335_v34 = vrot.slane %v315_v30, %v319_v18  ;;  %v339_v35 = vrot.slane %v315_v30, %v323_v19 }
 0x141   :  { %v342_v37 = vadd.f32 %v335_v34, %v327_v31  ;;  %v343_v38 = vadd.f32 %v339_v35, %v328_v32  ;;  %v344_v39 = vadd.f32 %v335_v34, %v329_v33  ;;  %v345_v40 = vadd.f32 %v339_v35, %v330_v36 }
 0x143   :  { %426 = vtanh.f32 %v342_v37 }
 0x144   :  { %428 = vtanh.f32 %v343_v38 }
 0x145   :  { %430 = vtanh.f32 %v344_v39 }
 0x146   :  { %432 = vtanh.f32 %v345_v40 }
 0x150   :  { %v427_v41 = vpop.eup %426 }
 0x151   :  { %v429_v20 = vpop.eup %428  ;;  %350 = vst [vmem:[#allocation9] sm:$0xff] %v427_v41 }
 0x152   :  { %v431_v21 = vpop.eup %430  ;;  %351 = vst [vmem:[#allocation9 + $0x8] sm:$0xff] %v429_v20 }
 0x153   :  { %v433_v22 = vpop.eup %432  ;;  %352 = vst [vmem:[#allocation9 + $0x10] sm:$0xff] %v431_v21 }
 0x154   :  { %353 = vst [vmem:[#allocation9 + $0x18] sm:$0xff] %v433_v22 }
 0x155   :  { %505 = shalt.err (!%p502_p5)
}
 0x156   :  { %s528_s29 = smov 256   ;;  %s529_s30 = smov 16  }
 0x157   :  { %365 = dma.vmem_to_hbm [thread:$0]  %s360_s2, 512, %s589_s3, [#allocation5], %s528_s29, %s528_s29, %s529_s30  }
 0x158   :  { %518 = dma.done.wait [#allocation5], 512  }
 0x159   :  { %519 = vsyncadd [#allocation5], 4294966784 }
 0x15a   :  { %369 = vsyncpa [#allocation4], 1 }
 0x15b   :  { %370 = vsyncpa [#allocation7], 1 }
 0x15c   :  { %371 = vsyncpa [#allocation5], 1 }

</bundles_post_ra>
